<compile_context>
chip_gen: v6e
topology: v6e:2x2x1
jax: 0.10.0
libtpu: 0.0.40
codegen_flags: <defaults>
</compile_context>

<pallas_src>
import functools
import numpy as np
import jax
import jax.numpy as jnp
from jax.experimental import pallas as pl
from jax.experimental.pallas import tpu as pltpu


def _ffn_kernel_eval(x_ref, wt_ref, o_ref, acc_ref):
    """out = relu(x @ wt); dropout is identity in eval mode."""
    k = pl.program_id(2)

    @pl.when(k == 0)
    def _init():
        acc_ref[...] = jnp.zeros_like(acc_ref)

    acc_ref[...] += jnp.dot(x_ref[...], wt_ref[...],
                            preferred_element_type=jnp.float32)

    @pl.when(k == pl.num_programs(2) - 1)
    def _finalize():
        o_ref[...] = jnp.maximum(acc_ref[...], 0.0).astype(o_ref.dtype)


def _ffn_kernel_train(x_ref, wt_ref, bits_ref, o_ref, acc_ref, *, p):
    """out = dropout(relu(x @ wt)) with integer-domain keep test."""
    k = pl.program_id(2)

    @pl.when(k == 0)
    def _init():
        acc_ref[...] = jnp.zeros_like(acc_ref)

    acc_ref[...] += jnp.dot(x_ref[...], wt_ref[...],
                            preferred_element_type=jnp.float32)

    @pl.when(k == pl.num_programs(2) - 1)
    def _finalize():
        y = jnp.maximum(acc_ref[...], 0.0)
        # keep with probability (1 - p): uint32 bits >= p * 2^32
        thresh = jnp.uint32(min(int(round(p * (1 << 32))), (1 << 32) - 1))
        keep = bits_ref[...] >= thresh
        scale = jnp.float32(1.0 / (1.0 - p))
        o_ref[...] = jnp.where(keep, y * scale, jnp.float32(0.0)).astype(o_ref.dtype)


def _pick_tile(dim, cap, align):
    """Largest tile <= cap that divides dim; aligned to `align` when splitting."""
    if dim <= cap:
        return dim
    t = (cap // align) * align
    while t >= align:
        if dim % t == 0:
            return t
        t -= align
    return dim  # no aligned divisor found; fall back to the full dimension


def positionwise_feed_forward(x, w1, *, dropout_p=0.1, train=False, rng_key=None,
                              block_m=512, block_n=512, block_k=512):
    """x: (..., d_model);  w1: (d_ff, d_model)  (PyTorch nn.Linear weight layout).

    Returns dropout(relu(x @ w1.T)) with PyTorch dropout semantics
    (train=False -> identity; train=True -> zero w.p. p, scale by 1/(1-p)).
    """
    orig_shape = x.shape
    d_model = orig_shape[-1]
    d_ff, d_model_w = w1.shape
    assert d_model == d_model_w, "w1 must have shape (d_ff, d_model)"

    M = int(np.prod(orig_shape[:-1])) if len(orig_shape) > 1 else 1
    K, N = d_model, d_ff

    x2 = x.reshape(M, K)
    wt = jnp.transpose(w1)                      # (K, N) so that y = x @ w1.T = x2 @ wt

    tm = _pick_tile(M, block_m, 8)
    tn = _pick_tile(N, block_n, 128)
    tk = _pick_tile(K, block_k, 128)
    grid = (M // tm, N // tn, K // tk)

    use_dropout = bool(train) and float(dropout_p) > 0.0

    in_specs = [
        pl.BlockSpec((tm, tk), lambda i, j, k: (i, k)),   # x tile
        pl.BlockSpec((tk, tn), lambda i, j, k: (k, j)),   # w.T tile
    ]
    args = [x2, wt]

    if use_dropout:
        if rng_key is None:
            rng_key = jax.random.PRNGKey(0)
        # Output-shaped uint32 random bits; block index (i, j) is constant
        # across the k reduction, so each tile is fetched once.
        bits = jax.random.bits(rng_key, (M, N), dtype=jnp.uint32)
        in_specs.append(pl.BlockSpec((tm, tn), lambda i, j, k: (i, j)))
        args.append(bits)
        kernel = functools.partial(_ffn_kernel_train, p=float(dropout_p))
    else:
        kernel = _ffn_kernel_eval

    # TODO(synk): optional bf16 streaming-I/O path (f32 accumulate, cast on store)
    # would halve HBM traffic; kept f32 here to match the PyTorch module's dtype.
    out2 = pl.pallas_call(
        kernel,
        out_shape=jax.ShapeDtypeStruct((M, N), x.dtype),
        grid=grid,
        in_specs=in_specs,
        out_specs=pl.BlockSpec((tm, tn), lambda i, j, k: (i, j)),
        scratch_shapes=[pltpu.VMEM((tm, tn), jnp.float32)],
        compiler_params=pltpu.CompilerParams(
            dimension_semantics=("parallel", "parallel", "arbitrary")),
    )(*args)

    return out2.reshape(*orig_shape[:-1], N)


if __name__ == "__main__":
    # Small but tiling-exercising shapes: grid = (1, 2, 2) with 256-wide tiles.
    B, T = 2, 8
    D_MODEL, D_FF = 512, 512
    P = 0.1

    key = jax.random.PRNGKey(0)
    kx, kw, kd = jax.random.split(key, 3)
    x = jax.random.normal(kx, (B, T, D_MODEL), dtype=jnp.float32)
    w1 = jax.random.normal(kw, (D_FF, D_MODEL), dtype=jnp.float32) / np.sqrt(D_MODEL)

    # --- eval mode: dropout is identity -> out = relu(x @ w1.T) ---
    out_eval = positionwise_feed_forward(x, w1, dropout_p=P, train=False,
                                         block_m=256, block_n=256, block_k=256)
    jax.block_until_ready(out_eval)
    ref = jnp.maximum(jnp.einsum('btd,fd->btf', x, w1), 0.0)
    np.testing.assert_allclose(np.asarray(out_eval), np.asarray(ref),
                               rtol=2e-2, atol=2e-2)

    # --- train mode: fused integer-threshold dropout ---
    out_train = positionwise_feed_forward(x, w1, dropout_p=P, train=True, rng_key=kd,
                                          block_m=256, block_n=256, block_k=256)
    jax.block_until_ready(out_train)

    # Reconstruct the exact same keep mask the kernel used.
    bits = jax.random.bits(kd, (B * T, D_FF), dtype=jnp.uint32)
    thresh = np.uint32(min(int(round(P * (1 << 32))), (1 << 32) - 1))
    keep = (bits >= thresh).reshape(B, T, D_FF)
    ref_train = jnp.where(keep, ref / (1.0 - P), 0.0)
    np.testing.assert_allclose(np.asarray(out_train), np.asarray(ref_train),
                               rtol=2e-2, atol=2e-2)

    print("KERNEL_OK")
</pallas_src>

<mosaic_0001>
module attributes {stable_mosaic.version = 11 : i64} {
  func.func @_ffn_kernel_eval(%arg0: i32, %arg1: i32, %arg2: i32, %arg3: memref<16x256xf32, #tpu.memory_space<vmem>>, %arg4: memref<256x256xf32, #tpu.memory_space<vmem>>, %arg5: memref<16x256xf32, #tpu.memory_space<vmem>>, %arg6: memref<16x256xf32, #tpu.memory_space<vmem>>) attributes {dimension_semantics = [#tpu.dimension_semantics<parallel>, #tpu.dimension_semantics<parallel>, #tpu.dimension_semantics<arbitrary>], iteration_bounds = array<i64: 1, 2, 2>, scalar_prefetch = 0 : i64, scratch_operands = 1 : i64, tpu.core_type = #tpu.core_type<tc>, window_params = [{transform_indices = @transform_0, window_bounds = array<i64: 16, 256>}, {transform_indices = @transform_1, window_bounds = array<i64: 256, 256>}, {transform_indices = @transform_2, window_bounds = array<i64: 16, 256>}]} {
    %c0_i32 = arith.constant 0 : i32
    %0 = arith.cmpi eq, %arg2, %c0_i32 : i32
    %1 = arith.extui %0 : i1 to i32
    %c0_i32_0 = arith.constant 0 : i32
    %2 = arith.cmpi ne, %1, %c0_i32_0 : i32
    scf.if %2 {
      %cst_9 = arith.constant 0.000000e+00 : f32
      %12 = vector.broadcast %cst_9 : f32 to vector<16x256xf32>
      %c0_10 = arith.constant 0 : index
      %c0_11 = arith.constant 0 : index
      %13 = vector.load %arg6[%c0_10, %c0_11] : memref<16x256xf32, #tpu.memory_space<vmem>>, vector<16x256xf32>
      tpu.vector_store %arg6[%c0_10, %c0_11], %12 {strides = array<i32>} : memref<16x256xf32, #tpu.memory_space<vmem>>, vector<16x256xf32>,
    } else {
    }
    %c0 = arith.constant 0 : index
    %c0_1 = arith.constant 0 : index
    %3 = vector.load %arg6[%c0, %c0_1] : memref<16x256xf32, #tpu.memory_space<vmem>>, vector<16x256xf32>
    %c0_2 = arith.constant 0 : index
    %c0_3 = arith.constant 0 : index
    %4 = vector.load %arg3[%c0_2, %c0_3] : memref<16x256xf32, #tpu.memory_space<vmem>>, vector<16x256xf32>
    %c0_4 = arith.constant 0 : index
    %c0_5 = arith.constant 0 : index
    %5 = vector.load %arg4[%c0_4, %c0_5] : memref<256x256xf32, #tpu.memory_space<vmem>>, vector<256x256xf32>
    %cst = arith.constant dense<0.000000e+00> : vector<16x256xf32>
    %6 = tpu.matmul %4, %5, %cst {dimension_numbers = #tpu.dot_dimension_numbers<[1], [0], [0], [1], [0, 0, 1, 1], [], []>} : vector<16x256xf32>, vector<256x256xf32>, vector<16x256xf32> -> vector<16x256xf32>
    %7 = arith.addf %3, %6 : vector<16x256xf32>
    %c0_6 = arith.constant 0 : index
    %c0_7 = arith.constant 0 : index
    %8 = vector.load %arg6[%c0_6, %c0_7] : memref<16x256xf32, #tpu.memory_space<vmem>>, vector<16x256xf32>
    tpu.vector_store %arg6[%c0_6, %c0_7], %7 {strides = array<i32>} : memref<16x256xf32, #tpu.memory_space<vmem>>, vector<16x256xf32>,
    %c1_i32 = arith.constant 1 : i32
    %9 = arith.cmpi eq, %arg2, %c1_i32 : i32
    %10 = arith.extui %9 : i1 to i32
    %c0_i32_8 = arith.constant 0 : i32
    %11 = arith.cmpi ne, %10, %c0_i32_8 : i32
    scf.if %11 {
      %c0_9 = arith.constant 0 : index
      %c0_10 = arith.constant 0 : index
      %12 = vector.load %arg6[%c0_9, %c0_10] : memref<16x256xf32, #tpu.memory_space<vmem>>, vector<16x256xf32>
      %cst_11 = arith.constant 0.000000e+00 : f32
      %13 = vector.broadcast %cst_11 : f32 to vector<16x256xf32>
      %14 = arith.maximumf %12, %13 : vector<16x256xf32>
      %c0_12 = arith.constant 0 : index
      %c0_13 = arith.constant 0 : index
      %15 = vector.load %arg5[%c0_12, %c0_13] : memref<16x256xf32, #tpu.memory_space<vmem>>, vector<16x256xf32>
      tpu.vector_store %arg5[%c0_12, %c0_13], %14 {strides = array<i32>} : memref<16x256xf32, #tpu.memory_space<vmem>>, vector<16x256xf32>,
    } else {
    }
    return
  }
  func.func @transform_0(%arg0: i32, %arg1: i32, %arg2: i32) -> (i32, i32) {
    %c0_i32 = arith.constant 0 : i32
    return %arg0, %arg2 : i32, i32
  }
  func.func @transform_1(%arg0: i32, %arg1: i32, %arg2: i32) -> (i32, i32) {
    %c0_i32 = arith.constant 0 : i32
    return %arg2, %arg1 : i32, i32
  }
  func.func @transform_2(%arg0: i32, %arg1: i32, %arg2: i32) -> (i32, i32) {
    %c0_i32 = arith.constant 0 : i32
    return %arg0, %arg1 : i32, i32
  }
}

</mosaic_0001>

<bundles_post_ra>
// kernel: tpu_custom_call.1
= control target key start
LH: loop header
LB: loop body
LE: loop exit
PB: predicated region body
PF: predicated region fallthrough
CT: control target
= control target key end

     0   :  { %s1403_s0 = inlined_call_operand.hbm [shape: f32[16,512], index: 0, kind: input, shape index: {}]   ;;  %s1404_s1 = inlined_call_operand.hbm [shape: f32[512,512], index: 1, kind: input, shape index: {}]   ;;  %s1405_s2 = inlined_call_operand.hbm [shape: f32[16,512], index: 2, kind: output, shape index: {}]  }
   0x1   :  { %1416 = sst [smem:[#allocation19_spill]] %s1403_s0 }
   0x2   :  { %1417 = sst [smem:[#allocation20_spill]] %s1405_s2 }
   0x3   :  { %7 = vsyncpa [#allocation4], 0 }
   0x4   :  { %9 = vsyncpa [#allocation4 + $0x1], 0 }
   0x5   :  { %10 = vsyncpa [#allocation7], 0 }
   0x6   :  { %12 = vsyncpa [#allocation7 + $0x1], 0 }
   0x7   :  { %13 = vsyncpa [#allocation5], 0 }
   0x8   :  { %15 = vsyncpa [#allocation5 + $0x1], 0  ;;  %s1015_s9 = smov 0   ;;  %s1017_s10 = smov 0  }
   0x9   :  { %s1019_s11 = smov 0   ;;  %s1021_s12 = smov 0  }
   0xa   :  { %s1023_s13 = smov 0   ;;  %s1025_s14 = smov 0  }
   0xb   :  { %s1027_s15 = smov 0   ;;  %s1029_s16 = smov 0  }
   0xc   :  { %s1031_s17 = smov 0   ;;  %s1033_s18 = smov 0  }
   0xd   :  { %s1035_s19 = smov 0   ;;  %s1037_s20 = smov 0  }
   0xe   :  { %s1039_s21 = smov 0   ;;  %s1041_s22 = smov 0  }
   0xf LB: > { %1418 = sst [smem:[#allocation12_spill]] %s968_s17  ;;  %s556_s23 = sadd.s32 4294967295, %s988_s22   ;;  %s988_s22 = sphi %s1041_s22, %s21_s22   ;;  %s984_s21 = sphi %s1039_s21, %s1451_s21   ;;  %s980_s20 = sphi %s1037_s20, %s1461_s20   ;;  %s976_s19 = sphi %s1035_s19, %s1449_s19   ;;  %s972_s18 = sphi %s1033_s18, %s1460_s18   ;;  %s968_s17 = sphi %s1031_s17, %s1448_s17   ;;  %s964_s16 = sphi %s1029_s16, %s1459_s16   ;;  %s960_s15 = sphi %s1027_s15, %s1458_s15   ;;  %s956_s14 = sphi %s1025_s14, %s1457_s14   ;;  %s952_s13 = sphi %s1023_s13, %s1456_s13   ;;  %s948_s12 = sphi %s1021_s12, %s1455_s12   ;;  %s944_s11 = sphi %s1019_s11, %s1454_s11   ;;  %s940_s10 = sphi %s1017_s10, %s1453_s10   ;;  %s936_s9 = sphi %s1015_s9, %s1452_s9  }
  0x10   : > { %1419 = sst [smem:[#allocation13_spill]] %s976_s19  ;;  %s33_s24 = sadd.s32 1, %s980_s20 }
  0x11   : > { %1420 = sst [smem:[#allocation14_spill]] %s984_s21  ;;  %p1085_p0 = scmp.ge.s32.totalorder %s33_s24, 2 }
  0x12   : > { %s49_s26 = sadd.s32 1, %s968_s17  ;;  %p56_p1 = scmp.ne.s32.totalorder %s968_s17, %s964_s16 }
  0x13   : > { %p1409_p2 = scmp.eq.s32.totalorder %s988_s22, 0  ;;  %s1463_s24 = smov (%p1085_p0, %s33_s24), 0 }
  0x14   : > { %1422 = sst [smem:[#allocation15_spill]] %s1463_s24  ;;  %p62_p4 = scmp.ne.s32.totalorder %s964_s16, %s960_s15 }
  0x15   : > { %p1099_p3 = por %p1409_p2, %p56_p1  ;;  %s1106_s28 = ssub.s32 %s980_s20, %s1463_s24 }
  0x16   : > { %p1108_p5 = scmp.eq.s32.totalorder %s556_s23, 0  ;;  %p47_p6 = scmp.eq.s32.totalorder %s1106_s28, 0 }
  0x17   : > { %p1113_p7 = scmp.eq.s32.totalorder %s556_s23, 3  ;;  %p663_p9 = scmp.lt.s32.totalorder %s988_s22, 4 }
  0x18   : > { %p1119_p8 = por %p1108_p5, %p62_p4  ;;  %s142_s5 = sand.u32 1, %s968_s17  }
  0x19   : > { %s1124_s4 = scalar_select %p47_p6, %s968_s17, %s49_s26  }
  0x1a   : > { %s1426_s3 = scalar_select %p1119_p8, 1, 0 }
  0x1b   : > { %1427 = sst [smem:[#allocation16_spill]] %s1124_s4  ;;  %s560_s6 = sshll.u32 %s142_s5, 5 }
  0x1c   : > { %s579_s7 = sshll.u32 %s980_s20, 8  ;;  %s1428_s0 = sld [smem:[#allocation19_spill]] }
  0x1d   : > { %s146_s2 = scalar_lea.vmem [#allocation3], %s560_s6  ;;  %p1136_p10 = pnand %p663_p9, %p1099_p3 }
  0x1e   : > { %s156_s23 = sshll.u32 %s146_s2, 4  ;;  %s143_s26 = scalar_lea.sflag [#allocation4], %s142_s5  ;;  %s157_s23 = int_to_ptr.vmem [resolvable:$true] %s156_s23 }
  0x1f   : > { %p786_p11 = pneg %p1136_p10  ;;  %s797_s4 = scalar_lea.vmem %s157_s23, 512 }
  0x20   : > { %p798_p12 = scmp.ne.s32.totalorder %s157_s23, %s797_s4  ;;  %s990_s17 = smov [#allocation3]  }
  0x21   : > { %s802_s8 = sshll.u32 %s990_s17, 4  ;;  %s803_s8 = int_to_ptr.vmem [resolvable:$false] %s802_s8 }
  0x22   : > { %s155_s24 = scalar_lea.hbm %s1428_s0, %s579_s7  ;;  %p800_p13 = pnand %p798_p12, %p786_p11 }
  0x23   : > { %s804_s6 = scalar_lea.vmem %s803_s8, 1024  ;;  %p805_p4 = scmp.lt.s32.totalorder %s157_s23, %s803_s8 }
  0x24   : > { %p801_p1 = pneg %p800_p13  ;;  %p806_p6 = scmp.lt.s32.totalorder %s804_s6, %s797_s4 }
  0x26   : > { %p807_p2 = por %p806_p6, %p805_p4 }
  0x28   : > { %p808_p8 = pnand %p807_p2, %p801_p1 }
  0x2a   : > { %811 = shalt.err (!%p808_p8)
}
  0x2b   : > { %s1411_s2 = smov 512   ;;  %s1412_s17 = smov 256  }
  0x2c   : > { %s1413_s27 = smov 16   ;;  %p568_p2 = scmp.ge.s32.totalorder %s988_s22, 1 }
  0x2d   : > { %655 = dma.hbm_to_vmem [thread:$0]  (!%p1136_p10), %s155_s24, 512, %s157_s23, %s143_s26, %s1411_s2, %s1412_s17, %s1413_s27  }
  0x2e   : > { %p188_p3 = scmp.lt.s32.totalorder %s988_s22, 5  ;;  %s557_s5 = sadd.s32 4294967294, %s988_s22  }
  0x2f   : > { %s36_s7 = sadd.s32 1, %s984_s21  ;;  %s77_s15 = sadd.s32 1, %s956_s14 }
  0x30   : > { %p1149_p8 = pnand %p568_p2, %p188_p3  ;;  %s1465_s7 = smov (!%p1085_p0, %s36_s7), %s984_s21 }
  0x31   : > { %p84_p11 = scmp.ne.s32.totalorder %s956_s14, %s952_s13  ;;  %p90_p10 = scmp.ne.s32.totalorder %s952_s13, %s948_s12 }
  0x32   : > { %p38_p12 = scmp.ge.s32.totalorder %s1465_s7, 2  ;;  %s105_s19 = sadd.s32 1, %s944_s11 }
  0x33   : > { %p1431_p13 = scmp.eq.s32.totalorder %s988_s22, 0  ;;  %p1172_p4 = por %p90_p10, %p1108_p5 }
  0x34   : > { %s1467_s7 = smov (%p38_p12, %s1465_s7), 0  ;;  %p115_p0 = scmp.ne.s32.totalorder %s944_s11, %s940_s10 }
  0x35   : > { %p1166_p1 = por %p84_p11, %p1431_p13  ;;  %1434 = sst [smem:[#allocation17_spill]] %s1467_s7 }
  0x36   : > { %p121_p6 = scmp.ne.s32.totalorder %s940_s10, %s936_s9  ;;  %s73_s12 = ssub.s32 %s984_s21, %s1467_s7 }
  0x37   : > { %p122_p2 = scmp.eq.s32.totalorder %s557_s5, 3  ;;  %s74_s25 = sor.u32 %s73_s12, %s1106_s28 }
  0x38   : > { %p103_p3 = scmp.eq.s32.totalorder %s73_s12, 0  ;;  %p75_p11 = scmp.eq.s32.totalorder %s74_s25, 0 }
  0x39   : > { %p1187_p13 = por %p1113_p7, %p115_p0  ;;  %p1197_p5 = por %p122_p2, %p121_p6 }
  0x3a   : > { %s1192_s26 = scalar_select %p103_p3, %s944_s11, %s105_s19  }
  0x3b   : > { %s1195_s8 = scalar_select %p75_p11, %s956_s14, %s77_s15  }
  0x3c   : > { %s166_s2 = sand.u32 1, %s956_s14   ;;  %s565_s28 = sshll.u32 %s984_s21, 1 }
  0x3d   : > { %1436 = sst [smem:[#allocation18_spill]] %s1195_s8  ;;  %s563_s5 = sshll.u32 %s166_s2, 9 }
  0x3e   : > { %s580_s17 = sshll.u32 %s980_s20, 7  ;;  %s170_s27 = scalar_lea.vmem [#allocation6], %s563_s5 }
  0x3f   : > { %s180_s12 = sshll.u32 %s170_s27, 4  ;;  %s177_s25 = sadd.s32 %s580_s17, %s565_s28  ;;  %s181_s12 = int_to_ptr.vmem [resolvable:$true] %s180_s12 }
  0x40   : > { %s567_s30 = sshll.u32 %s177_s25, 7  ;;  %p1208_p7 = pnand %p663_p9, %p1166_p1 }
  0x41   : > { %s179_s7 = scalar_lea.hbm %s1404_s1, %s567_s30  ;;  %s167_s8 = scalar_lea.sflag [#allocation7], %s166_s2 }
  0x42   : > { %p814_p10 = pneg %p1208_p7  ;;  %s825_s21 = scalar_lea.vmem %s181_s12, 8192 }
  0x43   : > { %p826_p12 = scmp.ne.s32.totalorder %s181_s12, %s825_s21  ;;  %s994_s17 = smov [#allocation6]  }
  0x44   : > { %s830_s27 = sshll.u32 %s994_s17, 4  ;;  %s831_s27 = int_to_ptr.vmem [resolvable:$false] %s830_s27 }
  0x45   : > { %p828_p0 = pnand %p826_p12, %p814_p10  ;;  %s832_s24 = scalar_lea.vmem %s831_s27, 16384 }
  0x46   : > { %p833_p9 = scmp.lt.s32.totalorder %s181_s12, %s831_s27  ;;  %p834_p1 = scmp.lt.s32.totalorder %s832_s24, %s825_s21 }
  0x47   : > { %p829_p6 = pneg %p828_p0 }
  0x48   : > { %p835_p2 = por %p834_p1, %p833_p9 }
  0x4a   : > { %p836_p3 = pnand %p835_p2, %p829_p6 }
  0x4c   : > { %839 = shalt.err (!%p836_p3)
}
  0x4d   : > { %s1439_s0 = smov 16   ;;  %s1440_s5 = smov 256  }
  0x4e   : > { %s1441_s2 = smov 512   ;;  %192 = sbr.rel (%p1149_p8) target bundleno = 398 (0x18e), region = 28 }
  0x4f   : > { %658 = dma.hbm_to_vmem [thread:$0]  (!%p1208_p7), %s179_s7, 8192, %s181_s12, %s167_s8, %s1441_s2, %s1440_s5, %s1439_s0  }
  0x50   : > { %s194_s28 = sand.u32 (!%p1149_p8), 1, %s964_s16   ;;  %p1442_p11 = scmp.ne.s32.totalorder (!%p1149_p8), %s1426_s3, 0 }
  0x51   : > { %s569_s25 = sshll.u32 (!%p1149_p8), %s194_s28, 5  ;;  %s195_s30 = scalar_lea.sflag (!%p1149_p8), [#allocation4], %s194_s28 }
  0x52   : > { %s1225_s15 = scalar_lea.vmem (!%p1149_p8), [#allocation3], %s569_s25 }
  0x53   : > { %923 = dma.done.wait (%p1442_p11), %s195_s30, 512  }
  0x54   : > { %925 = vsyncadd (%p1442_p11), %s195_s30, 4294966784  ;;  %s203_s21 = sand.u32 1, %s952_s13  }
  0x55   : > { %s570_s19 = sshll.u32 %s203_s21, 9  ;;  %s204_s7 = scalar_lea.sflag [#allocation7], %s203_s21 }
  0x56   : > { %s1232_s8 = scalar_lea.vmem [#allocation6], %s570_s19 }
  0x57   : > { %927 = dma.done.wait (%p1172_p4), %s204_s7, 8192  }
  0x58   : > { %929 = vsyncadd (%p1172_p4), %s204_s7, 4294959104  ;;  %s230_s4 = sand.u32 1, %s940_s10   ;;  %p572_p8 = scmp.ne.s32.totalorder %s972_s18, 0 }
  0x59   : > { %s571_s12 = sshll.u32 %s230_s4, 5 }
  0x5a   : > { %s1241_s17 = scalar_lea.vmem [#allocation8], %s571_s12  ;;  %242 = sbr.rel (%p572_p8) target bundleno = 98 (0x62), region = 40 }
  0x5f   : > { %v995_v0 = vmov 0.0  }
  0x60   : > { %243 = vst [vmem:[#allocation2 + $0x10] sm:$0xff] %v995_v0  ;;  %244 = vst [vmem:[#allocation2] sm:$0xff] %v995_v0 }
  0x61   : > { %245 = vst [vmem:[#allocation2 + $0x18] sm:$0xff] %v995_v0  ;;  %246 = vst [vmem:[#allocation2 + $0x8] sm:$0xff] %v995_v0 }
  0x62 PF: > { %v286_v1 = vld [vmem:[%s1232_s8 + $0xf8] sm:$0xff]  ;;  %v285_v2 = vld [vmem:[%s1232_s8 + $0xf0] sm:$0xff]  ;;  %v284_v3 = vld [vmem:[%s1232_s8 + $0xe8] sm:$0xff]  ;;  %p573_p4 = scmp.ne.s32.totalorder %s972_s18, 1 }
  0x63   : > { %319 = vmatprep.subr.mxu0 %v286_v1  ;;  %582 = vmatprep.subr.mxu1 %v286_v1  ;;  %v283_v4 = vld [vmem:[%s1232_s8 + $0xe0] sm:$0xff]  ;;  %v282_v5 = vld [vmem:[%s1232_s8 + $0xd8] sm:$0xff]  ;;  %v281_v6 = vld [vmem:[%s1232_s8 + $0xd0] sm:$0xff] }
  0x64   : > { %320 = vmatpush1.msra.mxu0 %v285_v2  ;;  %614 = vmatpush1.msra.mxu1 %v285_v2  ;;  %v280_v7 = vld [vmem:[%s1232_s8 + $0xc8] sm:$0xff]  ;;  %v279_v8 = vld [vmem:[%s1232_s8 + $0xc0] sm:$0xff]  ;;  %v278_v9 = vld [vmem:[%s1232_s8 + $0xb8] sm:$0xff] }
  0x65   : > { %321 = vmatprep.subr.mxu0 %v284_v3  ;;  %583 = vmatprep.subr.mxu1 %v284_v3  ;;  %v277_v10 = vld [vmem:[%s1232_s8 + $0xb0] sm:$0xff]  ;;  %v276_v11 = vld [vmem:[%s1232_s8 + $0xa8] sm:$0xff]  ;;  %v275_v12 = vld [vmem:[%s1232_s8 + $0xa0] sm:$0xff] }
  0x66   : > { %322 = vmatpush1.msra.mxu0 %v283_v4  ;;  %615 = vmatpush1.msra.mxu1 %v283_v4  ;;  %v274_v13 = vld [vmem:[%s1232_s8 + $0x98] sm:$0xff]  ;;  %v273_v14 = vld [vmem:[%s1232_s8 + $0x90] sm:$0xff]  ;;  %v272_v15 = vld [vmem:[%s1232_s8 + $0x88] sm:$0xff] }
  0x67   : > { %323 = vmatprep.subr.mxu0 %v282_v5  ;;  %584 = vmatprep.subr.mxu1 %v282_v5  ;;  %v271_v16 = vld [vmem:[%s1232_s8 + $0x80] sm:$0xff]  ;;  %v270_v17 = vld [vmem:[%s1232_s8 + $0x78] sm:$0xff]  ;;  %v269_v18 = vld [vmem:[%s1232_s8 + $0x70] sm:$0xff] }
  0x68   : > { %324 = vmatpush1.msra.mxu0 %v281_v6  ;;  %616 = vmatpush1.msra.mxu1 %v281_v6  ;;  %v268_v19 = vld [vmem:[%s1232_s8 + $0x68] sm:$0xff]  ;;  %v267_v20 = vld [vmem:[%s1232_s8 + $0x60] sm:$0xff]  ;;  %v266_v21 = vld [vmem:[%s1232_s8 + $0x58] sm:$0xff] }
  0x69   : > { %325 = vmatprep.subr.mxu0 %v280_v7  ;;  %585 = vmatprep.subr.mxu1 %v280_v7  ;;  %v265_v22 = vld [vmem:[%s1232_s8 + $0x50] sm:$0xff]  ;;  %v264_v23 = vld [vmem:[%s1232_s8 + $0x48] sm:$0xff]  ;;  %v263_v24 = vld [vmem:[%s1232_s8 + $0x40] sm:$0xff] }
  0x6a   : > { %326 = vmatpush1.msra.mxu0 %v279_v8  ;;  %617 = vmatpush1.msra.mxu1 %v279_v8  ;;  %v262_v25 = vld [vmem:[%s1232_s8 + $0x38] sm:$0xff]  ;;  %v261_v26 = vld [vmem:[%s1232_s8 + $0x30] sm:$0xff]  ;;  %v260_v27 = vld [vmem:[%s1232_s8 + $0x28] sm:$0xff] }
  0x6b   : > { %327 = vmatprep.subr.mxu0 %v278_v9  ;;  %586 = vmatprep.subr.mxu1 %v278_v9  ;;  %v259_v28 = vld [vmem:[%s1232_s8 + $0x20] sm:$0xff]  ;;  %v258_v29 = vld [vmem:[%s1232_s8 + $0x18] sm:$0xff]  ;;  %v257_v30 = vld [vmem:[%s1232_s8 + $0x10] sm:$0xff] }
  0x6c   : > { %328 = vmatpush1.msra.mxu0 %v277_v10  ;;  %618 = vmatpush1.msra.mxu1 %v277_v10  ;;  %v256_v31 = vld [vmem:[%s1232_s8 + $0x8] sm:$0xff]  ;;  %v255_v32 = vld [vmem:[%s1232_s8] sm:$0xff]  ;;  %v318_v33 = vld [vmem:[%s1232_s8 + $0x1f8] sm:$0xff] }
  0x6d   : > { %329 = vmatprep.subr.mxu0 %v276_v11  ;;  %587 = vmatprep.subr.mxu1 %v276_v11  ;;  %v317_v34 = vld [vmem:[%s1232_s8 + $0x1f0] sm:$0xff]  ;;  %v316_v35 = vld [vmem:[%s1232_s8 + $0x1e8] sm:$0xff]  ;;  %v315_v36 = vld [vmem:[%s1232_s8 + $0x1e0] sm:$0xff] }
  0x6e   : > { %330 = vmatpush1.msra.mxu0 %v275_v12  ;;  %619 = vmatpush1.msra.mxu1 %v275_v12  ;;  %v314_v37 = vld [vmem:[%s1232_s8 + $0x1d8] sm:$0xff]  ;;  %v313_v38 = vld [vmem:[%s1232_s8 + $0x1d0] sm:$0xff]  ;;  %v312_v39 = vld [vmem:[%s1232_s8 + $0x1c8] sm:$0xff] }
  0x6f   : > { %331 = vmatprep.subr.mxu0 %v274_v13  ;;  %588 = vmatprep.subr.mxu1 %v274_v13  ;;  %v311_v40 = vld [vmem:[%s1232_s8 + $0x1c0] sm:$0xff]  ;;  %v310_v41 = vld [vmem:[%s1232_s8 + $0x1b8] sm:$0xff]  ;;  %v309_v42 = vld [vmem:[%s1232_s8 + $0x1b0] sm:$0xff] }
  0x70   : > { %332 = vmatpush1.msra.mxu0 %v273_v14  ;;  %620 = vmatpush1.msra.mxu1 %v273_v14  ;;  %v308_v43 = vld [vmem:[%s1232_s8 + $0x1a8] sm:$0xff]  ;;  %v307_v44 = vld [vmem:[%s1232_s8 + $0x1a0] sm:$0xff]  ;;  %v306_v45 = vld [vmem:[%s1232_s8 + $0x198] sm:$0xff] }
  0x71   : > { %333 = vmatprep.subr.mxu0 %v272_v15  ;;  %589 = vmatprep.subr.mxu1 %v272_v15  ;;  %v305_v46 = vld [vmem:[%s1232_s8 + $0x190] sm:$0xff]  ;;  %v304_v47 = vld [vmem:[%s1232_s8 + $0x188] sm:$0xff]  ;;  %v303_v48 = vld [vmem:[%s1232_s8 + $0x180] sm:$0xff] }
  0x72   : > { %334 = vmatpush1.msra.mxu0 %v271_v16  ;;  %621 = vmatpush1.msra.mxu1 %v271_v16  ;;  %v302_v49 = vld [vmem:[%s1232_s8 + $0x178] sm:$0xff]  ;;  %v301_v50 = vld [vmem:[%s1232_s8 + $0x170] sm:$0xff]  ;;  %v300_v51 = vld [vmem:[%s1232_s8 + $0x168] sm:$0xff] }
  0x73   : > { %335 = vmatprep.subr.mxu0 %v270_v17  ;;  %590 = vmatprep.subr.mxu1 %v270_v17  ;;  %v299_v52 = vld [vmem:[%s1232_s8 + $0x160] sm:$0xff]  ;;  %v298_v53 = vld [vmem:[%s1232_s8 + $0x158] sm:$0xff]  ;;  %v297_v54 = vld [vmem:[%s1232_s8 + $0x150] sm:$0xff] }
  0x74   : > { %336 = vmatpush1.msra.mxu0 %v269_v18  ;;  %622 = vmatpush1.msra.mxu1 %v269_v18  ;;  %v296_v55 = vld [vmem:[%s1232_s8 + $0x148] sm:$0xff]  ;;  %v295_v56 = vld [vmem:[%s1232_s8 + $0x140] sm:$0xff]  ;;  %v294_v57 = vld [vmem:[%s1232_s8 + $0x138] sm:$0xff] }
  0x75   : > { %337 = vmatprep.subr.mxu0 %v268_v19  ;;  %591 = vmatprep.subr.mxu1 %v268_v19  ;;  %v293_v58 = vld [vmem:[%s1232_s8 + $0x130] sm:$0xff]  ;;  %v292_v59 = vld [vmem:[%s1232_s8 + $0x128] sm:$0xff]  ;;  %v291_v60 = vld [vmem:[%s1232_s8 + $0x120] sm:$0xff] }
  0x76   : > { %338 = vmatpush1.msra.mxu0 %v267_v20  ;;  %623 = vmatpush1.msra.mxu1 %v267_v20  ;;  %v290_v61 = vld [vmem:[%s1232_s8 + $0x118] sm:$0xff]  ;;  %v289_v62 = vld [vmem:[%s1232_s8 + $0x110] sm:$0xff]  ;;  %v288_v63 = vld [vmem:[%s1232_s8 + $0x108] sm:$0xff] }
  0x77   : > { %339 = vmatprep.subr.mxu0 %v266_v21  ;;  %592 = vmatprep.subr.mxu1 %v266_v21  ;;  %v287_v0 = vld [vmem:[%s1232_s8 + $0x100] sm:$0xff]  ;;  %v252_v1 = vld [vmem:[%s1225_s15 + $0x8] sm:$0xff]  ;;  %v254_v2 = vld [vmem:[%s1225_s15 + $0x18] sm:$0xff] }
  0x78   : > { %340 = vmatpush1.msra.mxu0 %v265_v22  ;;  %624 = vmatpush1.msra.mxu1 %v265_v22  ;;  %v251_v3 = vld [vmem:[%s1225_s15] sm:$0xff]  ;;  %v253_v4 = vld [vmem:[%s1225_s15 + $0x10] sm:$0xff]  ;;  %v249_v6 = vld [vmem:[#allocation2 + $0x18] sm:$0xff] }
  0x79   : > { %341 = vmatprep.subr.mxu0 %v264_v23  ;;  %593 = vmatprep.subr.mxu1 %v264_v23  ;;  %v247_v5 = vld [vmem:[#allocation2 + $0x10] sm:$0xff]  ;;  %v248_v9 = vld [vmem:[#allocation2] sm:$0xff]  ;;  %v250_v10 = vld [vmem:[#allocation2 + $0x8] sm:$0xff] }
  0x7a   : > { %342 = vmatpush1.msra.mxu0 %v263_v24  ;;  %625 = vmatpush1.msra.mxu1 %v263_v24 }
  0x7b   : > { %343 = vmatprep.subr.mxu0 %v262_v25  ;;  %594 = vmatprep.subr.mxu1 %v262_v25 }
  0x7c   : > { %344 = vmatpush1.msra.mxu0 %v261_v26  ;;  %626 = vmatpush1.msra.mxu1 %v261_v26 }
  0x7d   : > { %345 = vmatprep.subr.mxu0 %v260_v27  ;;  %595 = vmatprep.subr.mxu1 %v260_v27 }
  0x7e   : > { %346 = vmatpush1.msra.mxu0 %v259_v28  ;;  %627 = vmatpush1.msra.mxu1 %v259_v28 }
  0x7f   : > { %347 = vmatprep.subr.mxu0 %v258_v29  ;;  %596 = vmatprep.subr.mxu1 %v258_v29 }
  0x80   : > { %348 = vmatpush1.msra.mxu0 %v257_v30  ;;  %628 = vmatpush1.msra.mxu1 %v257_v30 }
  0x81   : > { %349 = vmatprep.subr.mxu0 %v256_v31  ;;  %597 = vmatprep.subr.mxu1 %v256_v31 }
  0x82   : > { %350 = vmatpush1.msra.mxu0 %v255_v32  ;;  %629 = vmatpush1.msra.mxu1 %v255_v32 }
  0x83   : > { %351 = vmatprep.subr.mxu0 %v318_v33  ;;  %598 = vmatprep.subr.mxu1 %v318_v33 }
  0x84   : > { %352 = vmatpush2.msra.mxu0 %v317_v34  ;;  %630 = vmatpush2.msra.mxu1 %v317_v34 }
  0x85   : > { %353 = vmatprep.subr.mxu0 %v316_v35  ;;  %599 = vmatprep.subr.mxu1 %v316_v35 }
  0x86   : > { %354 = vmatpush2.msra.mxu0 %v315_v36  ;;  %631 = vmatpush2.msra.mxu1 %v315_v36 }
  0x87   : > { %355 = vmatprep.subr.mxu0 %v314_v37  ;;  %600 = vmatprep.subr.mxu1 %v314_v37 }
  0x88   : > { %356 = vmatpush2.msra.mxu0 %v313_v38  ;;  %632 = vmatpush2.msra.mxu1 %v313_v38 }
  0x89   : > { %357 = vmatprep.subr.mxu0 %v312_v39  ;;  %601 = vmatprep.subr.mxu1 %v312_v39 }
  0x8a   : > { %358 = vmatpush2.msra.mxu0 %v311_v40  ;;  %633 = vmatpush2.msra.mxu1 %v311_v40 }
  0x8b   : > { %359 = vmatprep.subr.mxu0 %v310_v41  ;;  %602 = vmatprep.subr.mxu1 %v310_v41 }
  0x8c   : > { %360 = vmatpush2.msra.mxu0 %v309_v42  ;;  %634 = vmatpush2.msra.mxu1 %v309_v42 }
  0x8d   : > { %361 = vmatprep.subr.mxu0 %v308_v43  ;;  %603 = vmatprep.subr.mxu1 %v308_v43 }
  0x8e   : > { %362 = vmatpush2.msra.mxu0 %v307_v44  ;;  %635 = vmatpush2.msra.mxu1 %v307_v44 }
  0x8f   : > { %363 = vmatprep.subr.mxu0 %v306_v45  ;;  %604 = vmatprep.subr.mxu1 %v306_v45 }
  0x90   : > { %364 = vmatpush2.msra.mxu0 %v305_v46  ;;  %636 = vmatpush2.msra.mxu1 %v305_v46 }
  0x91   : > { %365 = vmatprep.subr.mxu0 %v304_v47  ;;  %605 = vmatprep.subr.mxu1 %v304_v47 }
  0x92   : > { %366 = vmatpush2.msra.mxu0 %v303_v48  ;;  %637 = vmatpush2.msra.mxu1 %v303_v48 }
  0x93   : > { %367 = vmatprep.subr.mxu0 %v302_v49  ;;  %606 = vmatprep.subr.mxu1 %v302_v49 }
  0x94   : > { %368 = vmatpush2.msra.mxu0 %v301_v50  ;;  %638 = vmatpush2.msra.mxu1 %v301_v50 }
  0x95   : > { %369 = vmatprep.subr.mxu0 %v300_v51  ;;  %607 = vmatprep.subr.mxu1 %v300_v51 }
  0x96   : > { %370 = vmatpush2.msra.mxu0 %v299_v52  ;;  %639 = vmatpush2.msra.mxu1 %v299_v52 }
  0x97   : > { %371 = vmatprep.subr.mxu0 %v298_v53  ;;  %608 = vmatprep.subr.mxu1 %v298_v53 }
  0x98   : > { %372 = vmatpush2.msra.mxu0 %v297_v54  ;;  %640 = vmatpush2.msra.mxu1 %v297_v54 }
  0x99   : > { %373 = vmatprep.subr.mxu0 %v296_v55  ;;  %609 = vmatprep.subr.mxu1 %v296_v55 }
  0x9a   : > { %374 = vmatpush2.msra.mxu0 %v295_v56  ;;  %641 = vmatpush2.msra.mxu1 %v295_v56 }
  0x9b   : > { %375 = vmatprep.subr.mxu0 %v294_v57  ;;  %610 = vmatprep.subr.mxu1 %v294_v57 }
  0x9c   : > { %376 = vmatpush2.msra.mxu0 %v293_v58  ;;  %642 = vmatpush2.msra.mxu1 %v293_v58 }
  0x9d   : > { %377 = vmatprep.subr.mxu0 %v292_v59  ;;  %611 = vmatprep.subr.mxu1 %v292_v59 }
  0x9e   : > { %378 = vmatpush2.msra.mxu0 %v291_v60  ;;  %643 = vmatpush2.msra.mxu1 %v291_v60 }
  0x9f   : > { %379 = vmatprep.subr.mxu0 %v290_v61  ;;  %612 = vmatprep.subr.mxu1 %v290_v61 }
  0xa0   : > { %380 = vmatpush2.msra.mxu0 %v289_v62  ;;  %644 = vmatpush2.msra.mxu1 %v289_v62 }
  0xa1   : > { %381 = vmatprep.subr.mxu0 %v288_v63  ;;  %613 = vmatprep.subr.mxu1 %v288_v63 }
  0xa2   : > { %382 = vmatpush2.msra.mxu0 %v287_v0  ;;  %645 = vmatpush2.msra.mxu1 %v287_v0 }
  0xa3   : > { %383 = vmatprep.mubr.f32.mxu0 %v252_v1  ;;  %389 = vmatprep.mubr.f32.mxu1 %v254_v2 }
  0xa4   : > { %384 = vmatmul.mubr.f32.vlgmr.msra.gmra.mxu0 %v251_v3  ;;  %390 = vmatmul.mubr.f32.vlgmr.msra.gmra.mxu1 %v253_v4 }
 0x164   : > { %v385_v7 = vpop.f32.mrf.mxu0  ;;  %v391_v8 = vpop.f32.mrf.mxu1 }
 0x165   : > { %v396_v11 = vadd.f32 %v385_v7, %v247_v5  ;;  %v398_v12 = vadd.f32 %v391_v8, %v249_v6  ;;  %407 = sbr.rel (%p573_p4) target bundleno = 372 (0x174), region = 44 }
 0x166   : > { %v387_v13 = vpop.f32.mrf.mxu0  ;;  %v393_v14 = vpop.f32.mrf.mxu1 }
 0x167   : > { %400 = vst [vmem:[#allocation2 + $0x10] sm:$0xff] %v396_v11  ;;  %402 = vst [vmem:[#allocation2 + $0x18] sm:$0xff] %v398_v12  ;;  %v397_v15 = vadd.f32 %v387_v13, %v248_v9  ;;  %v399_v16 = vadd.f32 %v393_v14, %v250_v10 }
 0x169   : > { %401 = vst [vmem:[#allocation2] sm:$0xff] %v397_v15  ;;  %403 = vst [vmem:[#allocation2 + $0x8] sm:$0xff] %v399_v16 }
 0x16e   : > { %v408_v17 = vld [vmem:[#allocation2 + $0x10] sm:$0xff]  ;;  %v410_v19 = vld [vmem:[#allocation2 + $0x18] sm:$0xff] }
 0x16f   : > { %v412_v20 = vmax.f32 %v408_v17, 0.0  ;;  %v414_v22 = vmax.f32 %v410_v19, 0.0 }
 0x170   : > { %v409_v18 = vld [vmem:[#allocation2] sm:$0xff]  ;;  %v411_v23 = vld [vmem:[#allocation2 + $0x8] sm:$0xff] }
 0x171   : > { %v413_v21 = vmax.f32 %v409_v18, 0.0  ;;  %v415_v24 = vmax.f32 %v411_v23, 0.0  ;;  %416 = vst [vmem:[%s1241_s17] sm:$0xff] %v412_v20  ;;  %418 = vst [vmem:[%s1241_s17 + $0x10] sm:$0xff] %v414_v22 }
 0x173   : > { %417 = vst [vmem:[%s1241_s17 + $0x8] sm:$0xff] %v413_v21  ;;  %419 = vst [vmem:[%s1241_s17 + $0x18] sm:$0xff] %v415_v24 }
 0x174 PF: > { %s1443_s3 = sld [smem:[#allocation13_spill]]  ;;  %s437_s5 = sshll.u32 %s1241_s17, 4  ;;  %s1324_s5 = int_to_ptr.vmem [resolvable:$true] %s437_s5 }
 0x175   : > { %s1444_s24 = sld [smem:[#allocation20_spill]]  ;;  %s1328_s2 = scalar_lea.sflag [#allocation5], %s230_s4 }
 0x176   : > { %s840_s28 = scalar_lea.vmem %s1324_s5, 512  ;;  %s996_s25 = smov [#allocation8]  }
 0x177   : > { %p841_p7 = scmp.ne.s32.totalorder %s1324_s5, %s840_s28  ;;  %s844_s30 = sshll.u32 %s996_s25, 4  ;;  %s845_s30 = int_to_ptr.vmem [resolvable:$false] %s844_s30 }
 0x178   : > { %s846_s15 = scalar_lea.vmem %s845_s30, 1024  ;;  %p847_p0 = scmp.lt.s32.totalorder %s1324_s5, %s845_s30 }
 0x179   : > { %p842_p10 = pnand %p841_p7, %p1187_p13  ;;  %p848_p6 = scmp.lt.s32.totalorder %s846_s15, %s840_s28 }
 0x17a   : > { %s581_s18 = sshll.u32 %s1443_s3, 8 }
 0x17b   : > { %s1321_s0 = scalar_lea.hbm %s1444_s24, %s581_s18  ;;  %p843_p12 = pneg %p842_p10 }
 0x17c   : > { %p849_p9 = por %p848_p6, %p847_p0 }
 0x17e   : > { %p850_p1 = pnand %p849_p9, %p843_p12 }
 0x180   : > { %853 = shalt.err (!%p850_p1)
}
 0x181   : > { %s854_s21 = scalar_lea.hbm %s1321_s0, 512  ;;  %s858_s8 = scalar_lea.hbm %s1444_s24, 1024 }
 0x182   : > { %p855_p2 = scmp.ne.s32.totalorder %s1321_s0, %s854_s21  ;;  %p859_p8 = scmp.lt.s32.totalorder %s1321_s0, %s1444_s24 }
 0x183   : > { %p860_p4 = scmp.lt.s32.totalorder %s858_s8, %s854_s21 }
 0x184   : > { %p856_p3 = pnand %p855_p2, %p1187_p13 }
 0x185   : > { %p861_p7 = por %p860_p4, %p859_p8 }
 0x186   : > { %p857_p11 = pneg %p856_p3 }
 0x188   : > { %p862_p10 = pnand %p861_p7, %p857_p11 }
 0x18a   : > { %865 = shalt.err (!%p862_p10)
}
 0x18b   : > { %s997_s17 = smov 256   ;;  %s998_s3 = smov 512  }
 0x18c   : > { %s999_s18 = smov 16  }
 0x18d   : > { %650 = dma.vmem_to_hbm [thread:$0]  (%p1187_p13), %s1324_s5, 512, %s1321_s0, %s1328_s2, %s997_s17, %s998_s3, %s999_s18  }
 0x18e PF: > { %p664_p12 = scmp.ge.s32.totalorder %s988_s22, 2  ;;  %s452_s23 = sand.u32 1, %s936_s9  }
 0x18f   : > { %s453_s27 = scalar_lea.sflag [#allocation5], %s452_s23 }
 0x190   : > { %p660_p0 = pnand %p664_p12, %p1197_p5 }
 0x192   : > { %p661_p6 = pneg %p660_p0 }
 0x194   : > { %931 = dma.done.wait (%p661_p6), %s453_s27, 512  }
 0x195   : > { %933 = vsyncadd (%p661_p6), %s453_s27, 4294966784  ;;  %s21_s22 = sadd.s32 1, %s988_s22   ;;  %s1446_s29 = sld [smem:[#allocation18_spill]] }
 0x196   : > { %p1356_p9 = scmp.ge.s32.totalorder %s21_s22, 6   ;;  %s1447_s0 = sld [smem:[#allocation12_spill]] }
 0x197   : > { %s1448_s17 = sld [smem:[#allocation16_spill]]  ;;  %s1452_s9 = smov %s940_s10 }
 0x198   : > { %s1449_s19 = sld [smem:[#allocation14_spill]]  ;;  %s1453_s10 = smov %s944_s11 }
 0x199   : > { %s1450_s6 = sld [smem:[#allocation15_spill]]  ;;  %s1454_s11 = smov %s1192_s26 }
 0x19a   : > { %s1451_s21 = sld [smem:[#allocation17_spill]]  ;;  %s1455_s12 = smov %s952_s13 }
 0x19b   : > { %s1456_s13 = smov %s956_s14  ;;  %s1457_s14 = smov %s1446_s29 }
 0x19c   : > { %s1458_s15 = smov %s964_s16  ;;  %s1459_s16 = smov %s1447_s0 }
 0x19d   : > { %s1460_s18 = smov %s980_s20  ;;  %20 = sbr.rel (!%p1356_p9) target bundleno = 15 (0xf), region = 94 }
 0x19f   : > { %s1461_s20 = smov %s1450_s6 }
 0x1a2   :  { %458 = vsyncpa [#allocation4], 1 }
 0x1a3   :  { %460 = vsyncpa [#allocation4 + $0x1], 1 }
 0x1a4   :  { %461 = vsyncpa [#allocation7], 1 }
 0x1a5   :  { %463 = vsyncpa [#allocation7 + $0x1], 1 }
 0x1a6   :  { %464 = vsyncpa [#allocation5], 1 }
 0x1a7   :  { %466 = vsyncpa [#allocation5 + $0x1], 1 }

</bundles_post_ra>
